<compile_context>
chip_gen: v6e
topology: v6e:2x2x1
jax: 0.10.0
libtpu: 0.0.40
codegen_flags: <defaults>
</compile_context>

<pallas_src>
import functools
import math

import jax
import jax.numpy as jnp
from jax.experimental import pallas as pl
from jax.experimental.pallas import tpu as pltpu


# ----------------------------------------------------------------------------
# shared helpers
# ----------------------------------------------------------------------------
def _layernorm(x, w, b, eps=1e-5):
    """fp16-safe LayerNorm: compute in f32, cast back (matches the torch subclass)."""
    orig = x.dtype
    xf = x.astype(jnp.float32)
    mu = jnp.mean(xf, axis=-1, keepdims=True)
    var = jnp.mean((xf - mu) ** 2, axis=-1, keepdims=True)
    y = (xf - mu) * jax.lax.rsqrt(var + eps)
    return (y * w.astype(jnp.float32) + b.astype(jnp.float32)).astype(orig)


# ----------------------------------------------------------------------------
# 1) prologue: class token = mean(context), concat, ln_pre
# ----------------------------------------------------------------------------
def _prologue_kernel(xin_ref, w_ref, b_ref, out_ref):
    # xin row 0 is a zero placeholder for the class token; rows 1.. are the context.
    xin = xin_ref[...]                                        # (S, D)
    s, d = xin.shape
    xf = xin.astype(jnp.float32)
    row = jax.lax.broadcasted_iota(jnp.int32, (s, d), 0)
    is_ctx = row > 0
    mean = jnp.sum(jnp.where(is_ctx, xf, 0.0), axis=0, keepdims=True) / (s - 1)
    x = jnp.where(is_ctx, xf, mean).astype(xin.dtype)         # row0 <- mean(ctx)
    out_ref[...] = _layernorm(x, w_ref[...], b_ref[...])      # dense full-block store


def prologue(ctx, ln_w, ln_b):
    n, d = ctx.shape
    # Stage the class-token slot with a zero row; the kernel fills it with the mean
    # via a row mask so it only ever does dense, lane/sublane-aligned stores.
    xin = jnp.concatenate([jnp.zeros((1, d), ctx.dtype), ctx], axis=0)
    return pl.pallas_call(
        _prologue_kernel,
        out_shape=jax.ShapeDtypeStruct((n + 1, d), ctx.dtype),
    )(xin, ln_w, ln_b)


# ----------------------------------------------------------------------------
# 2) ResidualAttentionBlock
# ----------------------------------------------------------------------------
def _rab_kernel(x_ref,
                ln1_w_ref, ln1_b_ref,
                wqkv_ref, bqkv_ref, wo_ref, bo_ref,
                ln2_w_ref, ln2_b_ref,
                wfc_ref, bfc_ref, wproj_ref, bproj_ref,
                out_ref, *, n_head):
    """x + MHA(ln_1(x)), then x + c_proj(QuickGELU(c_fc(ln_2(x))))."""
    x = x_ref[...]                                  # (S, D)
    S, D = x.shape
    Dh = D // n_head
    cdt = x.dtype                                   # MXU operand dtype (bf16-friendly)

    # ---------------- attention branch ----------------
    h = _layernorm(x, ln1_w_ref[...], ln1_b_ref[...])
    # single fused QKV projection; 1/sqrt(Dh) is already folded into the q columns
    qkv = jnp.dot(h, wqkv_ref[...], preferred_element_type=jnp.float32)
    qkv = (qkv + bqkv_ref[...].astype(jnp.float32)).astype(cdt)

    # Per head: softmax(q k^T) v, with the output projection folded into the loop
    # so no H-way concatenate / lane-offset stores are ever materialized.
    # TODO(synk): for very long contexts switch to a flash-style KV-block loop
    # (running max/sum) to bound the (S, S) score live range; attn_mask path not
    # implemented (module is constructed with attn_mask=None).
    acc = jnp.zeros((S, D), jnp.float32)
    for hh in range(n_head):
        q = qkv[:, hh * Dh:(hh + 1) * Dh]
        k = qkv[:, D + hh * Dh:D + (hh + 1) * Dh]
        v = qkv[:, 2 * D + hh * Dh:2 * D + (hh + 1) * Dh]
        s = jnp.dot(q, k.T, preferred_element_type=jnp.float32)        # (S, S)
        s = s - jnp.max(s, axis=-1, keepdims=True)
        p = jnp.exp(s)
        # reciprocal+multiply instead of divide: the reciprocal runs on the EUP slot
        p = p * pl.reciprocal(jnp.sum(p, axis=-1, keepdims=True), approx=True)
        ho = jnp.dot(p.astype(cdt), v, preferred_element_type=jnp.float32).astype(cdt)
        acc = acc + jnp.dot(ho, wo_ref[pl.ds(hh * Dh, Dh), :],
                            preferred_element_type=jnp.float32)
    attn = acc + bo_ref[...].astype(jnp.float32)
    x = x + attn.astype(x.dtype)

    # ---------------- MLP branch ----------------
    h2 = _layernorm(x, ln2_w_ref[...], ln2_b_ref[...])
    u = jnp.dot(h2, wfc_ref[...], preferred_element_type=jnp.float32)
    u = u + bfc_ref[...].astype(jnp.float32)
    u = u * jax.nn.sigmoid(1.702 * u)               # QuickGELU
    m = jnp.dot(u.astype(cdt), wproj_ref[...], preferred_element_type=jnp.float32)
    m = m + bproj_ref[...].astype(jnp.float32)
    out_ref[...] = x + m.astype(x.dtype)


def residual_attention_block(x, layer_params, n_head):
    S, D = x.shape
    param_bytes = sum(int(a.size) * a.dtype.itemsize for a in layer_params)
    io_bytes = 2 * int(x.size) * x.dtype.itemsize
    cost = pl.CostEstimate(
        flops=int(24 * S * D * D + 4 * S * S * D),
        transcendentals=int(n_head * S * S + 4 * S * D),
        bytes_accessed=int(param_bytes + io_bytes),
    )
    # Size scoped VMEM to the real footprint (with headroom); floor at the default.
    vmem_limit = int(min(64 * 1024 * 1024,
                         max(32 * 1024 * 1024,
                             2 * (param_bytes + io_bytes) + (8 << 20))))
    return pl.pallas_call(
        functools.partial(_rab_kernel, n_head=n_head),
        out_shape=jax.ShapeDtypeStruct((S, D), x.dtype),
        compiler_params=pltpu.CompilerParams(vmem_limit_bytes=vmem_limit),
        cost_estimate=cost,
    )(x, *layer_params)


# ----------------------------------------------------------------------------
# 3) head: ln_post on the class token, mu / sigma MLPs, softplus
# ----------------------------------------------------------------------------
def _head_kernel(x_ref, lnw_ref, lnb_ref,
                 mw1_ref, mb1_ref, mw2_ref, mb2_ref,
                 sw1_ref, sb1_ref, sw2_ref, sb2_ref,
                 mu_ref, sigma_ref):
    x = _layernorm(x_ref[...], lnw_ref[...], lnb_ref[...])     # (1, D)
    cdt = x.dtype

    hm = jnp.dot(x, mw1_ref[...], preferred_element_type=jnp.float32) + mb1_ref[...].astype(jnp.float32)
    hm = jnp.maximum(hm, 0.0).astype(cdt)
    mu = jnp.dot(hm, mw2_ref[...], preferred_element_type=jnp.float32) + mb2_ref[...].astype(jnp.float32)

    hs = jnp.dot(x, sw1_ref[...], preferred_element_type=jnp.float32) + sb1_ref[...].astype(jnp.float32)
    hs = jnp.maximum(hs, 0.0).astype(cdt)
    raw = jnp.dot(hs, sw2_ref[...], preferred_element_type=jnp.float32) + sb2_ref[...].astype(jnp.float32)
    # F.softplus(beta=1, threshold=20): linear above the threshold
    sigma = jnp.where(raw > 20.0, raw, jnp.log(1.0 + jnp.exp(raw)))

    mu_ref[...] = mu.astype(mu_ref.dtype)
    sigma_ref[...] = sigma.astype(sigma_ref.dtype)


def head(x0, head_params):
    d_out = head_params[4].shape[1]     # mu second-layer output dim
    dt = x0.dtype
    return pl.pallas_call(
        _head_kernel,
        out_shape=(jax.ShapeDtypeStruct((1, d_out), dt),
                   jax.ShapeDtypeStruct((1, d_out), dt)),
    )(x0, *head_params)


# ----------------------------------------------------------------------------
# full TaskTokenTransformer forward
# ----------------------------------------------------------------------------
def fold_q_scale(wqkv, bqkv, d_model, n_head):
    """One-time host transform: fold 1/sqrt(head_dim) into the q part of the in-projection."""
    scale = 1.0 / math.sqrt(d_model // n_head)
    col = jnp.concatenate([jnp.full((1, d_model), scale, wqkv.dtype),
                           jnp.ones((1, 2 * d_model), wqkv.dtype)], axis=1)
    return wqkv * col, bqkv * col


def task_token_transformer(input_context, params, n_head):
    x = prologue(input_context, params["ln_pre_w"], params["ln_pre_b"])
    for lp in params["layers"]:
        x = residual_attention_block(x, lp, n_head)
    x0 = x[0:1, :]
    mu, sigma = head(x0, (params["ln_post_w"], params["ln_post_b"],
                          params["mu_w1"], params["mu_b1"], params["mu_w2"], params["mu_b2"],
                          params["sg_w1"], params["sg_b1"], params["sg_w2"], params["sg_b2"]))
    # TODO(synk): the torch module returns torch.distributions.Normal(mu, sigma);
    # here we return the (mu, sigma) pair that parameterizes it.
    return mu, sigma


# ----------------------------------------------------------------------------
# pure-JAX reference (for a sanity check)
# ----------------------------------------------------------------------------
def ref_forward(ctx, raw_layers, params, n_head):
    def ln(v, w, b, eps=1e-5):
        m = v.mean(-1, keepdims=True)
        var = ((v - m) ** 2).mean(-1, keepdims=True)
        return (v - m) / jnp.sqrt(var + eps) * w + b

    x = jnp.concatenate([ctx.mean(axis=0, keepdims=True), ctx], axis=0)
    x = ln(x, params["ln_pre_w"], params["ln_pre_b"])
    S, D = x.shape
    Dh = D // n_head
    for lp in raw_layers:
        h = ln(x, lp["ln1_w"], lp["ln1_b"])
        qkv = h @ lp["wqkv"] + lp["bqkv"]
        q, k, v = qkv[:, :D], qkv[:, D:2 * D], qkv[:, 2 * D:]
        q = q.reshape(S, n_head, Dh).transpose(1, 0, 2) / math.sqrt(Dh)
        k = k.reshape(S, n_head, Dh).transpose(1, 0, 2)
        v = v.reshape(S, n_head, Dh).transpose(1, 0, 2)
        p = jax.nn.softmax(jnp.einsum("hqd,hkd->hqk", q, k), axis=-1)
        o = jnp.einsum("hqk,hkd->hqd", p, v).transpose(1, 0, 2).reshape(S, D)
        x = x + o @ lp["wo"] + lp["bo"]
        h2 = ln(x, lp["ln2_w"], lp["ln2_b"])
        u = h2 @ lp["wfc"] + lp["bfc"]
        u = u * jax.nn.sigmoid(1.702 * u)
        x = x + u @ lp["wproj"] + lp["bproj"]
    x0 = ln(x[0:1, :], params["ln_post_w"], params["ln_post_b"])
    mu = jnp.maximum(x0 @ params["mu_w1"] + params["mu_b1"], 0.0) @ params["mu_w2"] + params["mu_b2"]
    sg = jnp.maximum(x0 @ params["sg_w1"] + params["sg_b1"], 0.0) @ params["sg_w2"] + params["sg_b2"]
    sigma = jnp.where(sg > 20.0, sg, jnp.log1p(jnp.exp(sg)))
    return mu, sigma


if __name__ == "__main__":
    N, D, H, LAYERS = 7, 32, 4, 2     # context points, width (=input_dim=output_dim), heads, layers
    key = jax.random.PRNGKey(0)
    keys = iter(jax.random.split(key, 64))

    def nrm(shape, s=0.05):
        return s * jax.random.normal(next(keys), shape, jnp.float32)

    ctx = jax.random.normal(next(keys), (N, D), jnp.float32)

    raw_layers = []
    for _ in range(LAYERS):
        raw_layers.append(dict(
            ln1_w=1.0 + nrm((1, D), 0.1), ln1_b=nrm((1, D), 0.1),
            wqkv=nrm((D, 3 * D)), bqkv=nrm((1, 3 * D)),
            wo=nrm((D, D)), bo=nrm((1, D)),
            ln2_w=1.0 + nrm((1, D), 0.1), ln2_b=nrm((1, D), 0.1),
            wfc=nrm((D, 4 * D)), bfc=nrm((1, 4 * D)),
            wproj=nrm((4 * D, D)), bproj=nrm((1, D)),
        ))

    params = dict(
        ln_pre_w=1.0 + nrm((1, D), 0.1), ln_pre_b=nrm((1, D), 0.1),
        ln_post_w=1.0 + nrm((1, D), 0.1), ln_post_b=nrm((1, D), 0.1),
        mu_w1=nrm((D, D)), mu_b1=nrm((1, D)), mu_w2=nrm((D, D)), mu_b2=nrm((1, D)),
        sg_w1=nrm((D, D)), sg_b1=nrm((1, D)), sg_w2=nrm((D, D)), sg_b2=nrm((1, D)),
    )
    # kernel-side per-layer params: q-scale folded into the in-projection (one-time)
    params["layers"] = []
    for lp in raw_layers:
        wqkv_s, bqkv_s = fold_q_scale(lp["wqkv"], lp["bqkv"], D, H)
        params["layers"].append((lp["ln1_w"], lp["ln1_b"], wqkv_s, bqkv_s,
                                 lp["wo"], lp["bo"], lp["ln2_w"], lp["ln2_b"],
                                 lp["wfc"], lp["bfc"], lp["wproj"], lp["bproj"]))

    mu, sigma = task_token_transformer(ctx, params, n_head=H)
    mu = jax.block_until_ready(mu)
    sigma = jax.block_until_ready(sigma)

    ref_mu, ref_sigma = ref_forward(ctx, raw_layers, params, n_head=H)
    assert mu.shape == (1, D) and sigma.shape == (1, D)
    assert bool(jnp.all(sigma > 0.0)), "sigma must be positive"
    assert jnp.allclose(mu, ref_mu, rtol=2e-2, atol=2e-2), "mu mismatch vs reference"
    assert jnp.allclose(sigma, ref_sigma, rtol=2e-2, atol=2e-2), "sigma mismatch vs reference"

    print("KERNEL_OK")
</pallas_src>

<mosaic_0001>
module attributes {stable_mosaic.version = 11 : i64} {
  func.func @_prologue_kernel(%arg0: memref<8x32xf32, #tpu.memory_space<vmem>>, %arg1: memref<1x32xf32, #tpu.memory_space<vmem>>, %arg2: memref<1x32xf32, #tpu.memory_space<vmem>>, %arg3: memref<8x32xf32, #tpu.memory_space<vmem>>) attributes {dimension_semantics = [], scalar_prefetch = 0 : i64, scratch_operands = 0 : i64, tpu.core_type = #tpu.core_type<tc>} {
    %c0 = arith.constant 0 : index
    %c0_0 = arith.constant 0 : index
    %0 = vector.load %arg0[%c0, %c0_0] : memref<8x32xf32, #tpu.memory_space<vmem>>, vector<8x32xf32>
    %1 = tpu.iota {dimensions = array<i32: 0>} : vector<8x32xi32>
    %c0_i32 = arith.constant 0 : i32
    %2 = vector.broadcast %c0_i32 : i32 to vector<8x32xi32>
    %3 = arith.cmpi sgt, %1, %2 : vector<8x32xi32>
    %cst = arith.constant 0.000000e+00 : f32
    %4 = vector.broadcast %cst : f32 to vector<8x32xf32>
    %5 = arith.select %3, %0, %4 : vector<8x32xi1>, vector<8x32xf32>
    %cst_1 = arith.constant dense<0.000000e+00> : vector<32xf32>
    %6 = vector.multi_reduction <add>, %5, %cst_1 [0] : vector<8x32xf32> to vector<32xf32>
    %7 = vector.shape_cast %6 : vector<32xf32> to vector<1x32xf32>
    %cst_2 = arith.constant 7.000000e+00 : f32
    %8 = vector.broadcast %cst_2 : f32 to vector<1x32xf32>
    %9 = arith.divf %7, %8 : vector<1x32xf32>
    %10 = vector.shape_cast %9 : vector<1x32xf32> to vector<1x32xf32>
    %11 = vector.broadcast %10 : vector<1x32xf32> to vector<8x32xf32>
    %12 = arith.select %3, %0, %11 : vector<8x32xi1>, vector<8x32xf32>
    %c0_3 = arith.constant 0 : index
    %c0_4 = arith.constant 0 : index
    %13 = vector.load %arg1[%c0_3, %c0_4] : memref<1x32xf32, #tpu.memory_space<vmem>>, vector<1x32xf32>
    %c0_5 = arith.constant 0 : index
    %c0_6 = arith.constant 0 : index
    %14 = vector.load %arg2[%c0_5, %c0_6] : memref<1x32xf32, #tpu.memory_space<vmem>>, vector<1x32xf32>
    %cst_7 = arith.constant dense<0.000000e+00> : vector<8xf32>
    %15 = vector.multi_reduction <add>, %12, %cst_7 [1] : vector<8x32xf32> to vector<8xf32>
    %16 = vector.shape_cast %15 : vector<8xf32> to vector<8x1xf32>
    %cst_8 = arith.constant 3.200000e+01 : f32
    %17 = vector.broadcast %cst_8 : f32 to vector<8x1xf32>
    %18 = arith.divf %16, %17 : vector<8x1xf32>
    %19 = vector.broadcast %18 : vector<8x1xf32> to vector<8x32xf32>
    %20 = arith.subf %12, %19 : vector<8x32xf32>
    %21 = arith.mulf %20, %20 : vector<8x32xf32>
    %cst_9 = arith.constant dense<0.000000e+00> : vector<8xf32>
    %22 = vector.multi_reduction <add>, %21, %cst_9 [1] : vector<8x32xf32> to vector<8xf32>
    %23 = vector.shape_cast %22 : vector<8xf32> to vector<8x1xf32>
    %cst_10 = arith.constant 3.200000e+01 : f32
    %24 = vector.broadcast %cst_10 : f32 to vector<8x1xf32>
    %25 = arith.divf %23, %24 : vector<8x1xf32>
    %26 = vector.broadcast %18 : vector<8x1xf32> to vector<8x32xf32>
    %27 = arith.subf %12, %26 : vector<8x32xf32>
    %cst_11 = arith.constant 9.99999974E-6 : f32
    %28 = vector.broadcast %cst_11 : f32 to vector<8x1xf32>
    %29 = arith.addf %25, %28 : vector<8x1xf32>
    %30 = math.rsqrt %29 : vector<8x1xf32>
    %31 = vector.broadcast %30 : vector<8x1xf32> to vector<8x32xf32>
    %32 = arith.mulf %27, %31 : vector<8x32xf32>
    %33 = vector.broadcast %13 : vector<1x32xf32> to vector<8x32xf32>
    %34 = arith.mulf %32, %33 : vector<8x32xf32>
    %35 = vector.broadcast %14 : vector<1x32xf32> to vector<8x32xf32>
    %36 = arith.addf %34, %35 : vector<8x32xf32>
    %c0_12 = arith.constant 0 : index
    %c0_13 = arith.constant 0 : index
    %37 = vector.load %arg3[%c0_12, %c0_13] : memref<8x32xf32, #tpu.memory_space<vmem>>, vector<8x32xf32>
    tpu.vector_store %arg3[%c0_12, %c0_13], %36 {strides = array<i32>} : memref<8x32xf32, #tpu.memory_space<vmem>>, vector<8x32xf32>,
    return
  }
}

</mosaic_0001>

<bundles_post_ra>
// kernel: tpu_custom_call.1
= control target key start
LH: loop header
LB: loop body
LE: loop exit
PB: predicated region body
PF: predicated region fallthrough
CT: control target
= control target key end

     0   :  { %8 = vsyncpa [#allocation3], 0  ;;  %s177_s0 = inlined_call_operand.hbm [shape: f32[8,32], index: 0, kind: input, shape index: {}]   ;;  %s178_s1 = inlined_call_operand.vmem [shape: f32[1,32], index: 1, kind: input, shape index: {}]   ;;  %s179_s2 = inlined_call_operand.vmem [shape: f32[1,32], index: 2, kind: input, shape index: {}]   ;;  %s180_s3 = inlined_call_operand.hbm [shape: f32[8,32], index: 3, kind: output, shape index: {}]  }
   0x1   :  { %9 = vsyncpa [#allocation4], 0  ;;  %s139_s12 = smov [#allocation2]  }
   0x2   :  { %s16_s13 = sshll.u32 %s139_s12, 4  ;;  %s17_s13 = int_to_ptr.vmem [resolvable:$true] %s16_s13 }
   0x3   :  { %s103_s14 = scalar_lea.vmem %s17_s13, 128  ;;  %p108_p1 = scmp.lt.s32.totalorder %s17_s13, %s17_s13 }
   0x4   :  { %p104_p0 = scmp.ne.s32.totalorder %s17_s13, %s103_s14  ;;  %p109_p2 = scmp.lt.s32.totalorder %s103_s14, %s103_s14 }
   0x6   :  { %p110_p3 = por %p109_p2, %p108_p1 }
   0x8   :  { %p111_p4 = pnand %p110_p3, %p104_p0 }
   0xa   :  { %114 = shalt.err (!%p111_p4)
}
   0xb   :  { %19 = dma.hbm_to_vmem [thread:$0]  %s177_s0, 128, %s17_s13, [#allocation3]  }
   0xc   :  { %135 = dma.done.wait [#allocation3], 128  }
   0xd   :  { %136 = vsyncadd [#allocation3], 4294967168  ;;  %v28_v0 = vlaneseq  ;;  %vm32_vm1 = vcmask 261120   ;;  %v27_v2 = vld [vmem:[#allocation2] sm:$0xff]  ;;  %s140_s20 = smov [#allocation5]  }
   0xe   :  { %v89_v23 = vld [vmem:[%s178_s1] ss:$0 sm:$0xff]  ;;  %s80_s21 = sshll.u32 %s140_s20, 4  ;;  %s81_s21 = int_to_ptr.vmem [resolvable:$true] %s80_s21 }
   0xf   :  { %v29_v1 = vshrl.u32 %v28_v0, 7  ;;  %v90_v25 = vld [vmem:[%s179_s2] ss:$0 sm:$0xff]  ;;  %s115_s22 = scalar_lea.vmem %s81_s21, 128  ;;  %p120_p6 = scmp.lt.s32.totalorder %s81_s21, %s81_s21 }
  0x10   :  { %p116_p5 = scmp.ne.s32.totalorder %s81_s21, %s115_s22  ;;  %p121_p7 = scmp.lt.s32.totalorder %s115_s22, %s115_s22 }
  0x11   :  { %vm30_vm0 = vcmp.gt.s32.totalorder %v29_v1, 0 }
  0x12   :  { %v31_v3 = vsel %vm30_vm0, %v27_v2, 0.0  ;;  %p122_p8 = por %p121_p7, %p120_p6 }
  0x13   :  { %v33_v4 = vsel %vm32_vm1, %v31_v3, 0.0 }
  0x14   :  { %v34_v5 = vrot.slane %v33_v4, 4  ;;  %p123_p9 = pnand %p122_p8, %p116_p5 }
  0x16   :  { %v35_v6 = vadd.f32 %v34_v5, %v33_v4 }
  0x18   :  { %v36_v7 = vrot.slane %v35_v6, 2 }
  0x1a   :  { %v37_v8 = vadd.f32 %v36_v7, %v35_v6 }
  0x1c   :  { %v38_v9 = vrot.slane %v37_v8, 1 }
  0x1e   :  { %v39_v10 = vadd.f32 %v38_v9, %v37_v8 }
  0x20   :  { %v41_v11 = vmul.f32 0.14285715, %v39_v10 }
  0x22   :  { %v42_v12 = vsel %vm30_vm0, %v27_v2, %v41_v11 }
  0x23   :  { %v45_v13 = vsel %vm32_vm1, %v42_v12, 0.0 }
  0x24   :  { %46 = vadd.xlane.f32.xlu0 %v45_v13 }
  0xad   :  { %v47_v14 = vpop.xlane.xlu0 %46 }
  0xae   :  { %v49_v15 = vmul.f32 0.03125, %v47_v14 }
  0xb0   :  { %v50_v16 = vsub.f32 %v42_v12, %v49_v15 }
  0xb2   :  { %v51_v17 = vmul.f32 %v50_v16, %v50_v16 }
  0xb4   :  { %v52_v18 = vsel %vm32_vm1, %v51_v17, 0.0 }
  0xb5   :  { %53 = vadd.xlane.f32.xlu0 %v52_v18 }
 0x13e   :  { %v54_v19 = vpop.xlane.xlu0 %53 }
 0x13f   :  { %v55_v20 = vmul.f32 0.03125, %v54_v19 }
 0x141   :  { %v56_v21 = vadd.f32 1e-05, %v55_v20 }
 0x143   :  { %93 = vrsqrt.f32 %v56_v21 }
 0x150   :  { %v94_v22 = vpop.eup %93 }
 0x151   :  { %v58_v24 = vmul.f32 %v94_v22, %v50_v16 }
 0x153   :  { %v65_v26 = vmul.f32 %v89_v23, %v58_v24 }
 0x155   :  { %v72_v27 = vadd.f32 %v90_v25, %v65_v26 }
 0x157   :  { %73 = vst.msk [vmem:[#allocation5] sm:$0xff] %vm32_vm1, %v72_v27 }
 0x158   :  { %126 = shalt.err (!%p123_p9)
}
 0x159   :  { %83 = dma.vmem_to_hbm [thread:$0]  %s81_s21, 128, %s180_s3, [#allocation4]  }
 0x15a   :  { %137 = dma.done.wait [#allocation4], 128  }
 0x15b   :  { %138 = vsyncadd [#allocation4], 4294967168 }
 0x15c   :  { %87 = vsyncpa [#allocation3], 1 }
 0x15d   :  { %88 = vsyncpa [#allocation4], 1 }

</bundles_post_ra>
